<compile_context>
chip_gen: v7x
topology: tpu7x:2x2x1
jax: 0.10.0
libtpu: 0.0.40
codegen_flags: <defaults>
</compile_context>

<pallas_src>
import math
from functools import partial

import jax
import jax.numpy as jnp
from jax.experimental import pallas as pl
from jax.experimental.pallas import tpu as pltpu


def _round_up(x, m):
    return ((x + m - 1) // m) * m


def _stacked_fc_kernel(x_ref, w_ref, b_ref, o_ref, acc_ref, *, act):
    # x_ref: (bm, tk)   batch x K tile
    # w_ref: (tk, tn)   fused-weight tile
    # b_ref: (1, tn)    fused-bias tile (f32)
    # o_ref: (bm, tn)   fused-layout output tile, or (1, bm, tn) direct layout
    # acc_ref: (bm, tn) f32 accumulator, resident across the K grid axis.
    k = pl.program_id(2)

    @pl.when(k == 0)
    def _():
        acc_ref[...] = jnp.zeros_like(acc_ref)

    acc_ref[...] += jnp.dot(x_ref[...], w_ref[...],
                            preferred_element_type=jnp.float32)

    @pl.when(k == pl.num_programs(2) - 1)
    def _():
        y = acc_ref[...] + b_ref[...].astype(jnp.float32)
        if act == "relu":
            y = jnp.maximum(y, 0.0)
        elif act == "sigmoid":
            y = jax.nn.sigmoid(y)
        elif act == "ssoftplus":          # ShiftedSoftplus(shift=-5.0)
            y = jax.nn.softplus(y - 5.0)
        # act == 'none': identity
        y = y.astype(o_ref.dtype)
        if len(o_ref.shape) == 3:         # direct (N, B, OUT_C) layout
            o_ref[0] = y
        else:                             # fused (B, N*OUT_C) layout
            o_ref[...] = y


def fuse_params(w, b):
    """One-time parameter re-layout (do at init, NOT per forward call).

    (N, IN_C, OUT_C) -> (IN_C, N*OUT_C),  (N, 1, OUT_C) -> (1, N*OUT_C).
    """
    n, in_c, out_c = w.shape
    w2 = jnp.transpose(w, (1, 0, 2)).reshape(in_c, n * out_c)
    b2 = b.reshape(1, n * out_c)
    return w2, b2


def _choose_tiles(b_rows, in_c, nc, out_c, itemsize, budget_bytes=32 << 20):
    """VMEM-budget-aware (bm, tn, tk) selection; budget is safe on v5e/v6e/v7x."""
    # K (reduction over IN_C) tile.
    tk = in_c if in_c <= 512 else 512
    # Lane tile over the fused N*OUT_C axis.
    direct_out = (out_c % 128 == 0) and (out_c <= 2048)
    if direct_out:
        tn = out_c                       # one stacked layer per lane tile
    else:
        tn = nc
        if nc > 2048 and nc % 128 == 0:
            for cand in (2048, 1024, 512, 256, 128):
                if nc % cand == 0:
                    tn = cand
                    break
    # Batch tile: largest candidate under the VMEM budget; aim for >=2 grid
    # steps on the batch axis once the batch is reasonably large.
    b_pad = _round_up(max(b_rows, 8), 8)
    target = b_pad if b_pad < 256 else _round_up(pl.cdiv(b_pad, 2), 8)
    bm = 8
    for cand in (1024, 512, 256, 128, 64, 32, 16, 8):
        if cand > target:
            continue
        vmem = ((2 * (cand * tk + cand * tn) + tk * tn + tn) * itemsize
                + cand * tn * 4)         # + f32 accumulator scratch
        if vmem <= budget_bytes:
            bm = cand
            break
    bm = min(bm, b_pad)
    return bm, tn, tk, direct_out


def stacked_fc_dense(x, w2, b2, n, out_c, *, act="relu", compute_dtype=None):
    """Forward of StackedFcDense.

    x: (B, IN_C); w2: (IN_C, N*OUT_C); b2: (1, N*OUT_C)  (see fuse_params)
    returns (N, B, OUT_C).
    """
    B, in_c = x.shape
    nc = n * out_c
    assert w2.shape == (in_c, nc) and b2.shape == (1, nc)

    out_dtype = x.dtype
    if compute_dtype is not None:
        # For production, store the fused weight directly in compute_dtype.
        x = x.astype(compute_dtype)
        w2 = w2.astype(compute_dtype)
    itemsize = jnp.dtype(x.dtype).itemsize

    bm, tn, tk, direct_out = _choose_tiles(B, in_c, nc, out_c, itemsize)

    # Pad to tile multiples (zero padding is exact; padded rows/lanes sliced off).
    b_pad = _round_up(max(B, bm), bm)
    k_pad = _round_up(in_c, tk)
    nc_pad = _round_up(nc, tn)
    if b_pad != B or k_pad != in_c:
        x = jnp.pad(x, ((0, b_pad - B), (0, k_pad - in_c)))
    if k_pad != in_c or nc_pad != nc:
        w2 = jnp.pad(w2, ((0, k_pad - in_c), (0, nc_pad - nc)))
        b2 = jnp.pad(b2, ((0, 0), (0, nc_pad - nc)))

    bt, nt, kt = b_pad // bm, nc_pad // tn, k_pad // tk
    grid = (bt, nt, kt)

    # Weight/bias are fetched once when their index map is grid-constant; a
    # single pipeline buffer halves their VMEM footprint in that case.
    w_kw = dict(pipeline_mode=pl.Buffered(1)) if (nt == 1 and kt == 1) else {}
    b_kw = dict(pipeline_mode=pl.Buffered(1)) if nt == 1 else {}

    in_specs = [
        pl.BlockSpec((bm, tk), lambda i, j, k: (i, k)),
        pl.BlockSpec((tk, tn), lambda i, j, k: (k, j), **w_kw),
        pl.BlockSpec((1, tn), lambda i, j, k: (0, j), **b_kw),
    ]
    if direct_out:
        out_shape = jax.ShapeDtypeStruct((n, b_pad, out_c), out_dtype)
        out_specs = pl.BlockSpec((1, bm, out_c), lambda i, j, k: (j, i, 0))
    else:
        out_shape = jax.ShapeDtypeStruct((b_pad, nc_pad), out_dtype)
        out_specs = pl.BlockSpec((bm, tn), lambda i, j, k: (i, j))

    est_vmem = ((2 * (bm * tk + bm * tn) + tk * tn + tn) * itemsize
                + bm * tn * 4)
    vmem_limit = int(min(max(est_vmem + (8 << 20), 32 << 20), 48 << 20))

    cost = pl.CostEstimate(
        flops=2 * b_pad * k_pad * nc_pad,
        transcendentals=(b_pad * nc_pad if act in ("sigmoid", "ssoftplus") else 0),
        bytes_accessed=(x.size * itemsize + w2.size * itemsize
                        + b2.size * b2.dtype.itemsize
                        + b_pad * nc_pad * jnp.dtype(out_dtype).itemsize),
    )

    y = pl.pallas_call(
        partial(_stacked_fc_kernel, act=act),
        out_shape=out_shape,
        grid_spec=pltpu.PrefetchScalarGridSpec(
            num_scalar_prefetch=0,
            grid=grid,
            in_specs=in_specs,
            out_specs=out_specs,
            scratch_shapes=[pltpu.VMEM((bm, tn), jnp.float32)],
        ),
        compiler_params=pltpu.CompilerParams(
            dimension_semantics=("parallel", "parallel", "arbitrary"),
            vmem_limit_bytes=vmem_limit,
        ),
        cost_estimate=cost,
    )(x, w2, b2)

    if direct_out:
        return y[:, :B, :]
    # Consumer-side layout plumbing: (B, N*OUT_C) -> (N, B, OUT_C).
    return jnp.transpose(y[:B, :nc].reshape(B, n, out_c), (1, 0, 2))


def init_params(key, n, in_c, out_c, gain):
    # Replicates torch.nn.init.xavier_uniform_ on a (n, in_c, out_c) tensor:
    # fan_in = in_c * out_c, fan_out = n * out_c (receptive field = out_c).
    fan_in = in_c * out_c
    fan_out = n * out_c
    bound = gain * math.sqrt(6.0 / (fan_in + fan_out))
    w = jax.random.uniform(key, (n, in_c, out_c), jnp.float32,
                           minval=-bound, maxval=bound)
    b = jnp.zeros((n, 1, out_c), jnp.float32)
    return w, b


if __name__ == "__main__":
    key = jax.random.PRNGKey(0)

    # ---- Case 1: fused-lane layout (OUT_C % 128 != 0), f32, relu ----------
    B, N, IN_C, OUT_C = 8, 4, 32, 32
    k1, k2, key = jax.random.split(key, 3)
    x = jax.random.normal(k1, (B, IN_C), jnp.float32)
    w, b = init_params(k2, N, IN_C, OUT_C, gain=math.sqrt(2.0))
    w2, b2 = fuse_params(w, b)                 # one-time re-layout (init time)
    out = jax.block_until_ready(stacked_fc_dense(x, w2, b2, N, OUT_C))
    ref = jnp.maximum(jnp.einsum("bi,nio->nbo", x, w) + b, 0.0)
    assert out.shape == (N, B, OUT_C)
    assert jnp.allclose(out, ref, atol=1e-5, rtol=1e-5)

    # ---- Case 2: direct (N, B, OUT_C) output (OUT_C % 128 == 0), f32 ------
    B, N, IN_C, OUT_C = 16, 2, 32, 128
    k1, k2, key = jax.random.split(key, 3)
    x = jax.random.normal(k1, (B, IN_C), jnp.float32)
    w, b = init_params(k2, N, IN_C, OUT_C, gain=math.sqrt(2.0))
    w2, b2 = fuse_params(w, b)
    out = jax.block_until_ready(stacked_fc_dense(x, w2, b2, N, OUT_C))
    ref = jnp.maximum(jnp.einsum("bi,nio->nbo", x, w) + b, 0.0)
    assert out.shape == (N, B, OUT_C)
    assert jnp.allclose(out, ref, atol=1e-5, rtol=1e-5)

    # ---- Case 3: bf16 MXU inputs with f32 accumulation (v6e/v7x path) -----
    out_bf = jax.block_until_ready(
        stacked_fc_dense(x, w2, b2, N, OUT_C, compute_dtype=jnp.bfloat16))
    assert jnp.allclose(out_bf, ref, atol=2e-2, rtol=2e-2)

    print("KERNEL_OK")
</pallas_src>

<mosaic_0001>
module attributes {stable_mosaic.version = 11 : i64} {
  func.func @_stacked_fc_kernel(%arg0: i32, %arg1: i32, %arg2: i32, %arg3: memref<8x32xf32, #tpu.memory_space<vmem>>, %arg4: memref<32x128xf32, #tpu.memory_space<vmem>>, %arg5: memref<1x128xf32, #tpu.memory_space<vmem>>, %arg6: memref<8x128xf32, #tpu.memory_space<vmem>>, %arg7: memref<8x128xf32, #tpu.memory_space<vmem>>) attributes {dimension_semantics = [#tpu.dimension_semantics<parallel>, #tpu.dimension_semantics<parallel>, #tpu.dimension_semantics<arbitrary>], iteration_bounds = array<i64: 1, 1, 1>, scalar_prefetch = 0 : i64, scratch_operands = 1 : i64, tpu.core_type = #tpu.core_type<tc>, window_params = [{transform_indices = @transform_0, window_bounds = array<i64: 8, 32>}, {pipeline_mode = #tpu.pipeline_mode<synchronous>, transform_indices = @transform_1, window_bounds = array<i64: 32, 128>}, {pipeline_mode = #tpu.pipeline_mode<synchronous>, transform_indices = @transform_2, window_bounds = array<i64: 1, 128>}, {transform_indices = @transform_3, window_bounds = array<i64: 8, 128>}]} {
    %c0_i32 = arith.constant 0 : i32
    %0 = arith.cmpi eq, %arg2, %c0_i32 : i32
    %1 = arith.extui %0 : i1 to i32
    %c0_i32_0 = arith.constant 0 : i32
    %2 = arith.cmpi ne, %1, %c0_i32_0 : i32
    scf.if %2 {
      %cst_10 = arith.constant 0.000000e+00 : f32
      %12 = vector.broadcast %cst_10 : f32 to vector<8x128xf32>
      %c0_11 = arith.constant 0 : index
      %c0_12 = arith.constant 0 : index
      %13 = vector.load %arg7[%c0_11, %c0_12] : memref<8x128xf32, #tpu.memory_space<vmem>>, vector<8x128xf32>
      tpu.vector_store %arg7[%c0_11, %c0_12], %12 {strides = array<i32>} : memref<8x128xf32, #tpu.memory_space<vmem>>, vector<8x128xf32>,
    } else {
    }
    %c0 = arith.constant 0 : index
    %c0_1 = arith.constant 0 : index
    %3 = vector.load %arg7[%c0, %c0_1] : memref<8x128xf32, #tpu.memory_space<vmem>>, vector<8x128xf32>
    %c0_2 = arith.constant 0 : index
    %c0_3 = arith.constant 0 : index
    %4 = vector.load %arg3[%c0_2, %c0_3] : memref<8x32xf32, #tpu.memory_space<vmem>>, vector<8x32xf32>
    %c0_4 = arith.constant 0 : index
    %c0_5 = arith.constant 0 : index
    %5 = vector.load %arg4[%c0_4, %c0_5] : memref<32x128xf32, #tpu.memory_space<vmem>>, vector<32x128xf32>
    %cst = arith.constant dense<0.000000e+00> : vector<8x128xf32>
    %6 = tpu.matmul %4, %5, %cst {dimension_numbers = #tpu.dot_dimension_numbers<[1], [0], [0], [1], [0, 0, 1, 1], [], []>} : vector<8x32xf32>, vector<32x128xf32>, vector<8x128xf32> -> vector<8x128xf32>
    %7 = arith.addf %3, %6 : vector<8x128xf32>
    %c0_6 = arith.constant 0 : index
    %c0_7 = arith.constant 0 : index
    %8 = vector.load %arg7[%c0_6, %c0_7] : memref<8x128xf32, #tpu.memory_space<vmem>>, vector<8x128xf32>
    tpu.vector_store %arg7[%c0_6, %c0_7], %7 {strides = array<i32>} : memref<8x128xf32, #tpu.memory_space<vmem>>, vector<8x128xf32>,
    %c0_i32_8 = arith.constant 0 : i32
    %9 = arith.cmpi eq, %arg2, %c0_i32_8 : i32
    %10 = arith.extui %9 : i1 to i32
    %c0_i32_9 = arith.constant 0 : i32
    %11 = arith.cmpi ne, %10, %c0_i32_9 : i32
    scf.if %11 {
      %c0_10 = arith.constant 0 : index
      %c0_11 = arith.constant 0 : index
      %12 = vector.load %arg7[%c0_10, %c0_11] : memref<8x128xf32, #tpu.memory_space<vmem>>, vector<8x128xf32>
      %c0_12 = arith.constant 0 : index
      %c0_13 = arith.constant 0 : index
      %13 = vector.load %arg5[%c0_12, %c0_13] : memref<1x128xf32, #tpu.memory_space<vmem>>, vector<1x128xf32>
      %14 = vector.broadcast %13 : vector<1x128xf32> to vector<8x128xf32>
      %15 = arith.addf %12, %14 : vector<8x128xf32>
      %cst_14 = arith.constant 0.000000e+00 : f32
      %16 = vector.broadcast %cst_14 : f32 to vector<8x128xf32>
      %17 = arith.maximumf %15, %16 : vector<8x128xf32>
      %c0_15 = arith.constant 0 : index
      %c0_16 = arith.constant 0 : index
      %18 = vector.load %arg6[%c0_15, %c0_16] : memref<8x128xf32, #tpu.memory_space<vmem>>, vector<8x128xf32>
      tpu.vector_store %arg6[%c0_15, %c0_16], %17 {strides = array<i32>} : memref<8x128xf32, #tpu.memory_space<vmem>>, vector<8x128xf32>,
    } else {
    }
    return
  }
  func.func @transform_0(%arg0: i32, %arg1: i32, %arg2: i32) -> (i32, i32) {
    %c0_i32 = arith.constant 0 : i32
    return %arg0, %arg2 : i32, i32
  }
  func.func @transform_1(%arg0: i32, %arg1: i32, %arg2: i32) -> (i32, i32) {
    %c0_i32 = arith.constant 0 : i32
    return %arg2, %arg1 : i32, i32
  }
  func.func @transform_2(%arg0: i32, %arg1: i32, %arg2: i32) -> (i32, i32) {
    %c0_i32 = arith.constant 0 : i32
    %c0_i32_0 = arith.constant 0 : i32
    return %c0_i32, %arg1 : i32, i32
  }
  func.func @transform_3(%arg0: i32, %arg1: i32, %arg2: i32) -> (i32, i32) {
    %c0_i32 = arith.constant 0 : i32
    return %arg0, %arg1 : i32, i32
  }
}

</mosaic_0001>

<bundles_post_ra>
// kernel: tpu_custom_call.1
= control target key start
LH: loop header
LB: loop body
LE: loop exit
PB: predicated region body
PF: predicated region fallthrough
CT: control target
= control target key end

     0   :  { %8 = vsyncpa [#allocation4], 0  ;;  %s336_s0 = inlined_call_operand.hbm [shape: f32[8,32], index: 0, kind: input, shape index: {}]   ;;  %s337_s1 = inlined_call_operand.hbm [shape: f32[32,128], index: 1, kind: input, shape index: {}]   ;;  %s338_s2 = inlined_call_operand.vmem [shape: f32[1,128], index: 2, kind: input, shape index: {}]   ;;  %s339_s3 = inlined_call_operand.hbm [shape: f32[8,128], index: 3, kind: output, shape index: {}]  }
   0x1   :  { %9 = vsyncpa [#allocation7], 0 }
   0x2   :  { %10 = vsyncpa [#allocation5], 0  ;;  %s262_s12 = smov [#allocation3]   ;;  %s263_s14 = smov [#allocation6]  }
   0x3   :  { %s17_s13 = sshll.u32 %s262_s12, 4  ;;  %s26_s15 = sshll.u32 %s263_s14, 4  ;;  %s18_s13 = int_to_ptr.vmem [resolvable:$true] %s17_s13  ;;  %s290_s15 = int_to_ptr.vmem [resolvable:$true] %s26_s15 }
   0x4   :  { %s190_s18 = scalar_lea.hbm %s336_s0, 128 }
   0x5   :  { %p191_p0 = scmp.ne.s32.totalorder %s336_s0, %s190_s18  ;;  %p194_p1 = scmp.lt.u32.totalorder %s190_s18, %s336_s0 }
   0x7   :  { %p196_p2 = pnand %p194_p1, %p191_p0 }
   0x9   :  { %199 = shalt.err (!%p196_p2)
}
   0xa   :  { %s200_s23 = scalar_lea.vmem %s18_s13, 128  ;;  %p205_p4 = scmp.lt.s32.totalorder %s18_s13, %s18_s13 }
   0xb   :  { %p201_p3 = scmp.ne.s32.totalorder %s18_s13, %s200_s23  ;;  %p206_p5 = scmp.lt.s32.totalorder %s200_s23, %s200_s23 }
   0xd   :  { %p207_p6 = por %p206_p5, %p205_p4 }
   0xf   :  { %p208_p7 = pnand %p207_p6, %p201_p3 }
  0x11   :  { %211 = shalt.err (!%p208_p7)
}
  0x12   :  { %20 = dma.hbm_to_vmem [thread:$0]  %s336_s0, 128, %s18_s13, [#allocation4]  }
  0x13   :  { %s212_s28 = scalar_lea.hbm %s337_s1, 512 }
  0x14   :  { %p213_p8 = scmp.ne.s32.totalorder %s337_s1, %s212_s28  ;;  %p216_p9 = scmp.lt.u32.totalorder %s212_s28, %s337_s1 }
  0x16   :  { %p218_p10 = pnand %p216_p9, %p213_p8 }
  0x18   :  { %221 = shalt.err (!%p218_p10)
}
  0x19   :  { %s222_s6 = scalar_lea.vmem %s290_s15, 512  ;;  %p227_p12 = scmp.lt.s32.totalorder %s290_s15, %s290_s15 }
  0x1a   :  { %p223_p11 = scmp.ne.s32.totalorder %s290_s15, %s222_s6  ;;  %p228_p13 = scmp.lt.s32.totalorder %s222_s6, %s222_s6 }
  0x1c   :  { %p229_p0 = por %p228_p13, %p227_p12 }
  0x1e   :  { %p230_p1 = pnand %p229_p0, %p223_p11 }
  0x20   :  { %233 = shalt.err (!%p230_p1)
}
  0x21   :  { %s264_s0 = smov 128   ;;  %s265_s7 = smov 8  }
  0x22   :  { %32 = dma.hbm_to_vmem [thread:$0]  %s337_s1, 512, %s290_s15, [#allocation7], %s264_s0, %s264_s0, %s265_s7  }
  0x23   :  { %256 = dma.done.wait [#allocation4], 128  }
  0x24   :  { %257 = vsyncadd [#allocation4], 4294967168 }
  0x25   :  { %258 = dma.done.wait [#allocation7], 512  }
  0x26   :  { %259 = vsyncadd [#allocation7], 4294966784  ;;  %v266_v0 = vmov 0.0|0.0   ;;  %vm267_vm0 = vmmov 0   ;;  %v268_v1 = vmov 0.0   ;;  %v48_v2 = vld [vmem:[#allocation6] sm:$0xff] }
  0x27   :  { %176 = vmatprep.subr.bf16.mxu0 %v266_v0  ;;  %173 = vmatprep.mubr.msk.f32.mxu0 %vm267_vm0, %v268_v1  ;;  %v49_v3 = vld [vmem:[#allocation6 + $0x8] sm:$0xff]  ;;  %v50_v4 = vld [vmem:[#allocation6 + $0x10] sm:$0xff]  ;;  %v51_v6 = vld [vmem:[#allocation6 + $0x18] sm:$0xff]  ;;  %vm52_vm1 = vcmask 261120   ;;  %s269_s11 = smov [#allocation8]  }
  0x28   :  { %v177_v5 = vpack.c.bf16 %v49_v3, %v48_v2  ;;  %v180_v7 = vpack.c.bf16 %v51_v6, %v50_v4  ;;  %v47_v8 = vld [vmem:[#allocation3] sm:$0xff]  ;;  %s148_s12 = sshll.u32 %s269_s11, 4  ;;  %s149_s12 = int_to_ptr.vmem [resolvable:$true] %s148_s12 }
  0x29   :  { %v159_v9 = vld [vmem:[%s338_s2] ss:$0 sm:$0xff]  ;;  %s234_s13 = scalar_lea.vmem %s149_s12, 128  ;;  %p239_p3 = scmp.lt.s32.totalorder %s149_s12, %s149_s12 }
  0x2a   :  { %178 = vmatpush3.bf16.msra.mxu0 %v177_v5  ;;  %p235_p2 = scmp.ne.s32.totalorder %s149_s12, %s234_s13  ;;  %p240_p4 = scmp.lt.s32.totalorder %s234_s13, %s234_s13 }
  0x2b   :  { %179 = vmatprep.subr.bf16.mxu0 %v266_v0 }
  0x2c   :  { %p241_p5 = por %p240_p4, %p239_p3 }
  0x2e   :  { %181 = vmatpush3.bf16.msra.mxu0 %v180_v7  ;;  %p242_p6 = pnand %p241_p5, %p235_p2 }
  0x31   :  { %174 = vmatmul.mubr.msk.f32.vlgmr.msra.gmra.mrb[0].mxu0 %vm52_vm1, %v47_v8 }
 0x104   :  { %v122_v10 = vpop.f32.mrb[0].mxu0 }
 0x105   :  { %v139_v11 = vadd.f32 %v159_v9, %v122_v10  ;;  %v175_v12 = vpop.f32.mrb[1].mxu0 }
 0x107   :  { %v140_v13 = vmax.f32 %v139_v11, 0.0 }
 0x109   :  { %141 = vst [vmem:[#allocation8] sm:$0xff] %v140_v13 }
 0x10a   :  { %245 = shalt.err (!%p242_p6)
}
 0x10b   :  { %s246_s16 = scalar_lea.hbm %s339_s3, 128 }
 0x10c   :  { %p247_p7 = scmp.ne.s32.totalorder %s339_s3, %s246_s16  ;;  %p250_p8 = scmp.lt.u32.totalorder %s246_s16, %s339_s3 }
 0x10e   :  { %p252_p9 = pnand %p250_p8, %p247_p7 }
 0x110   :  { %255 = shalt.err (!%p252_p9)
}
 0x111   :  { %151 = dma.vmem_to_hbm [thread:$0]  %s149_s12, 128, %s339_s3, [#allocation5]  }
 0x112   :  { %260 = dma.done.wait [#allocation5], 128  }
 0x113   :  { %261 = vsyncadd [#allocation5], 4294967168 }
 0x114   :  { %155 = vsyncpa [#allocation4], 1 }
 0x115   :  { %156 = vsyncpa [#allocation7], 1 }
 0x116   :  { %157 = vsyncpa [#allocation5], 1 }

</bundles_post_ra>
